<compile_context>
chip_gen: v7x
topology: tpu7x:2x2x1
jax: 0.10.0
libtpu: 0.0.40
codegen_flags: <defaults>
</compile_context>

<pallas_src>
import math

import jax
import jax.numpy as jnp
from jax import lax
from jax.experimental import pallas as pl
from jax.experimental.pallas import tpu as pltpu


# ----------------------------- Pallas kernel --------------------------------
def _discriminator_kernel(
    # graph data
    x_ref,       # [N, F_in] bf16
    adj_ref,     # [N, N]    int8   adj[target, source]
    pool_ref,    # [B, N]    bf16   (1/count rows per graph)
    seq_ref,     # [B, S]    bf16
    # packed weights
    w1_ref,      # [F_in, 4H] bf16  (q*scale | k | v | skip of conv1)
    w2_ref,      # [H,    4H] bf16  (q*scale | k | v | skip of conv2)
    whead_ref,   # [S+2H, H]  bf16  (wseq ; wfc1a ; wfc1b stacked on sublanes)
    wfc2_ref,    # [H,    4H] bf16  (fc2 weight tiled across all lanes)
    bias_ref,    # [4,    4H] f32   (b1 ; b2 ; [bseq|bfc1|0] ; bfc2 tiled)
    # output
    out_ref,     # [B, 4H] f32  (every lane holds the scalar logit)
):
    f32 = jnp.float32
    bf16 = jnp.bfloat16

    H = w2_ref.shape[0]          # hidden dim
    S = seq_ref.shape[1]         # sequence feature dim

    biases = bias_ref[...]                      # [4, W] f32
    b1 = biases[0:1, :]                         # conv1 fused bias (q part pre-scaled)
    b2 = biases[1:2, :]                         # conv2 fused bias (q part pre-scaled)
    bseq = biases[2:3, 0:H]
    bfc1 = biases[2:3, H:2 * H]
    bfc2 = biases[3:4, :]                       # tiled fc2 bias [1, W]

    def transformer_conv(h_bf16, w_ref, b_fused):
        # fused projection: one 128-lane matmul instead of four 32-lane ones.
        # q columns already carry the 1/sqrt(H) score scale (folded at pack time).
        qkvs = jnp.dot(h_bf16, w_ref[...], preferred_element_type=f32) + b_fused  # [N, 4H] f32
        qkv_bf = qkvs[:, 0:3 * H].astype(bf16)  # single 96-lane cast
        q = qkv_bf[:, 0:H]
        k = qkv_bf[:, H:2 * H]
        v = qkv_bf[:, 2 * H:3 * H]
        skip = qkvs[:, 3 * H:4 * H]             # root_weight=True path (stays f32)

        # mask lifetime is bounded to this layer (adj stays int8 in VMEM)
        mask = adj_ref[...] != 0                # [N, N] bool

        # scores[i, j] = <q_i, k_j>  (scale already folded into q)
        scores = lax.dot_general(
            q, k, (((1,), (1,)), ((), ())), preferred_element_type=f32)  # [N, N] f32
        scores = jnp.where(mask, scores, jnp.float32(-1e30))
        m = jnp.max(scores, axis=1, keepdims=True)
        # second where kept: rows with zero in-degree must produce e == 0
        e = jnp.where(mask, jnp.exp(scores - m), 0.0)                    # [N, N] f32
        rowsum = jnp.sum(e, axis=1, keepdims=True)                       # [N, 1]
        inv = pl.reciprocal(jnp.maximum(rowsum, 1e-16), approx=True)     # EUP, ~free

        # normalization folded AFTER the matmul: no N^2 divide, no alpha buffer
        agg = jnp.dot(e.astype(bf16), v, preferred_element_type=f32) * inv
        return jax.nn.relu(agg + skip)

    h1 = transformer_conv(x_ref[...], w1_ref, b1)                # [N, H] f32
    h2 = transformer_conv(h1.astype(bf16), w2_ref, b2)           # [N, H] f32

    # global mean pool as a matmul (pool rows = 1/count over each graph's nodes)
    pooled = jnp.dot(pool_ref[...], h2.astype(bf16),
                     preferred_element_type=f32)                 # [B, H] f32

    whead = whead_ref[...]                       # [S+2H, H] bf16
    wseq = whead[0:S, :]
    wfc1a = whead[S:S + H, :]
    wfc1b = whead[S + H:S + 2 * H, :]

    sfeat = jax.nn.relu(
        jnp.dot(seq_ref[...], wseq, preferred_element_type=f32) + bseq)
    # fc1 on concat([pooled, sfeat]) == pooled @ W1a + sfeat @ W1b + b1
    z = jax.nn.relu(
        jnp.dot(pooled.astype(bf16), wfc1a, preferred_element_type=f32)
        + jnp.dot(sfeat.astype(bf16), wfc1b, preferred_element_type=f32)
        + bfc1)
    # fc2 weight/bias are tiled across all W lanes -> lane-dense unmasked store
    y = jax.nn.sigmoid(
        jnp.dot(z.astype(bf16), wfc2_ref[...], preferred_element_type=f32) + bfc2)
    out_ref[...] = y.astype(out_ref.dtype)       # [B, W], every lane == logit


# ----------------------------- wrapper (glue) --------------------------------
def discriminator_forward(x, edge_index, batch, sequence_features, params,
                          num_graphs):
    """x: [N, F_in] node features, edge_index: [2, E] int32 (row0=src, row1=tgt),
    batch: [N] int32 graph id per node, sequence_features: [B, seq_dim]."""
    (wq1, bq1, wk1, bk1, wv1, bv1, ws1, bs1,
     wq2, bq2, wk2, bk2, wv2, bv2, ws2, bs2,
     wseq, bseq, wfc1a, wfc1b, bfc1, wfc2, bfc2) = params

    n, f_in = x.shape
    hidden = wq1.shape[1]
    sdim = sequence_features.shape[1]
    bsz = num_graphs
    W = 4 * hidden                                   # 128 for hidden=32
    bf16 = jnp.bfloat16
    scale = jnp.float32(1.0 / math.sqrt(hidden))

    # dense adjacency (int8): adj[target, source] = 1   (only O(N^2) input)
    adj = jnp.zeros((n, n), jnp.int8).at[edge_index[1], edge_index[0]].set(1)
    # global mean pool as a [B, N] matrix
    onehot = (batch[None, :] == jnp.arange(num_graphs)[:, None]).astype(jnp.float32)
    counts = jnp.sum(onehot, axis=1, keepdims=True)
    pool = onehot / jnp.maximum(counts, 1.0)

    # ---- pack the 23 small parameters into 5 arrays ----
    # score scale 1/sqrt(H) folded into the q projection (weight AND bias)
    w1 = jnp.concatenate([wq1 * scale, wk1, wv1, ws1], axis=1).astype(bf16)  # [F_in, 4H]
    w2 = jnp.concatenate([wq2 * scale, wk2, wv2, ws2], axis=1).astype(bf16)  # [H,    4H]
    b1 = jnp.concatenate([bq1 * scale, bk1, bv1, bs1], axis=1)               # [1,    4H]
    b2 = jnp.concatenate([bq2 * scale, bk2, bv2, bs2], axis=1)
    whead = jnp.concatenate([wseq, wfc1a, wfc1b], axis=0).astype(bf16)       # [S+2H, H]
    wfc2_t = jnp.tile(wfc2, (1, W)).astype(bf16)                             # [H,    4H]
    row2 = (jnp.zeros((1, W), jnp.float32)
            .at[:, :hidden].set(bseq)
            .at[:, hidden:2 * hidden].set(bfc1))
    row3 = jnp.tile(bfc2, (1, W))
    biases = jnp.concatenate([b1, b2, row2, row3], axis=0)                   # [4, 4H]

    inputs = (x.astype(bf16), adj, pool.astype(bf16),
              sequence_features.astype(bf16),
              w1, w2, whead, wfc2_t, biases)

    # ---- advisory cost / VMEM sizing ----
    flops = 2 * (n * f_in * W + n * hidden * W            # fused projections
                 + 2 * 2 * n * n * hidden                 # scores + e@v, both layers
                 + bsz * n * hidden                       # pooling
                 + bsz * sdim * hidden                    # sequence_fc
                 + 2 * bsz * hidden * hidden              # fc1 halves
                 + bsz * hidden * W)                      # fc2 (tiled)
    transcendentals = 2 * n * n + 2 * n + bsz * W
    in_bytes = int(sum(int(a.nbytes) for a in inputs))
    out_bytes = bsz * W * 4

    # No grid -> no double-buffering; size for the real peak + headroom,
    # capped below physical VMEM (64 MiB on v7x, 128 MiB on v5e/v6e).
    n2_live = n * n * (1 + 1 + 3 * 4)                     # adj(i8) + mask + ~3 f32 N^2 temps
    act_bytes = 2 * n * W * 4 + 6 * n * hidden * 4
    vmem_est = n2_live + act_bytes + in_bytes + out_bytes + (4 << 20)
    try:
        phys = int(getattr(pltpu.get_tpu_info(), "vmem_capacity_bytes", 64 << 20))
    except Exception:
        phys = 64 << 20
    vmem_cap = max(phys - (16 << 20), 32 << 20)           # leave compiler headroom
    vmem_bytes = int(min(max(vmem_est, 16 << 20), vmem_cap))

    vmem = pl.BlockSpec(memory_space=pltpu.MemorySpace.VMEM)
    out = pl.pallas_call(
        _discriminator_kernel,
        out_shape=jax.ShapeDtypeStruct((num_graphs, W), jnp.float32),
        in_specs=[vmem] * len(inputs),
        out_specs=vmem,
        compiler_params=pltpu.CompilerParams(vmem_limit_bytes=vmem_bytes),
        cost_estimate=pl.CostEstimate(flops=flops,
                                      transcendentals=transcendentals,
                                      bytes_accessed=in_bytes + out_bytes),
    )(*inputs)
    return out[:, :1]                                     # every lane holds the logit


# ----------------------------- reference (pure JAX, f32) ---------------------
def _reference(x, edge_index, batch, seq, params, num_graphs):
    (wq1, bq1, wk1, bk1, wv1, bv1, ws1, bs1,
     wq2, bq2, wk2, bk2, wv2, bv2, ws2, bs2,
     wseq, bseq, wfc1a, wfc1b, bfc1, wfc2, bfc2) = params
    n = x.shape[0]
    adj = jnp.zeros((n, n), jnp.float32).at[edge_index[1], edge_index[0]].set(1.0)

    def tconv(h, wq, bq, wk, bk, wv, bv, ws, bs):
        q, k, v = h @ wq + bq, h @ wk + bk, h @ wv + bv
        s = (q @ k.T) / math.sqrt(wq.shape[1])
        mask = adj > 0.5
        s = jnp.where(mask, s, -1e30)
        m = jnp.max(s, axis=1, keepdims=True)
        e = jnp.where(mask, jnp.exp(s - m), 0.0)
        a = e / jnp.maximum(jnp.sum(e, axis=1, keepdims=True), 1e-16)
        return a @ v + h @ ws + bs

    h1 = jax.nn.relu(tconv(x, wq1, bq1, wk1, bk1, wv1, bv1, ws1, bs1))
    h2 = jax.nn.relu(tconv(h1, wq2, bq2, wk2, bk2, wv2, bv2, ws2, bs2))
    onehot = (batch[None, :] == jnp.arange(num_graphs)[:, None]).astype(jnp.float32)
    pool = onehot / jnp.maximum(jnp.sum(onehot, axis=1, keepdims=True), 1.0)
    g = pool @ h2
    s = jax.nn.relu(seq @ wseq + bseq)
    z = jax.nn.relu(g @ wfc1a + s @ wfc1b + bfc1)
    return jax.nn.sigmoid(z @ wfc2 + bfc2)


# ----------------------------- main -------------------------------------------
if __name__ == "__main__":
    # small, module-consistent sizes
    INPUT_FEATURE_DIM = 8
    HIDDEN_DIM = 32
    SEQ_FEATURE_DIM = 16
    NUM_GRAPHS = 2
    NODES_PER_GRAPH = 6
    N = NUM_GRAPHS * NODES_PER_GRAPH

    key = jax.random.PRNGKey(0)
    ks = iter(jax.random.split(key, 40))

    def init(shape, scale=0.1):
        return (scale * jax.random.normal(next(ks), shape)).astype(jnp.float32)

    # weights stored as [in, out]; biases as [1, out] for clean broadcasting
    def tconv_params(f_in, f_out):
        return (init((f_in, f_out)), init((1, f_out)),   # query
                init((f_in, f_out)), init((1, f_out)),   # key
                init((f_in, f_out)), init((1, f_out)),   # value
                init((f_in, f_out)), init((1, f_out)))   # skip (root)

    params = (
        *tconv_params(INPUT_FEATURE_DIM, HIDDEN_DIM),    # conv1
        *tconv_params(HIDDEN_DIM, HIDDEN_DIM),           # conv2
        init((SEQ_FEATURE_DIM, HIDDEN_DIM)), init((1, HIDDEN_DIM)),      # sequence_fc
        init((HIDDEN_DIM, HIDDEN_DIM)),                  # fc1 (pooled half)
        init((HIDDEN_DIM, HIDDEN_DIM)),                  # fc1 (sequence half)
        init((1, HIDDEN_DIM)),                           # fc1 bias
        init((HIDDEN_DIM, 1)), init((1, 1)),             # fc2
    )

    # deterministic graph data
    x = jax.random.normal(next(ks), (N, INPUT_FEATURE_DIM)).astype(jnp.float32)
    seq = jax.random.normal(next(ks), (NUM_GRAPHS, SEQ_FEATURE_DIM)).astype(jnp.float32)
    batch = jnp.repeat(jnp.arange(NUM_GRAPHS, dtype=jnp.int32), NODES_PER_GRAPH)

    # edges: a directed ring within each graph (src -> tgt), both directions
    src_list, tgt_list = [], []
    for g in range(NUM_GRAPHS):
        base = g * NODES_PER_GRAPH
        for i in range(NODES_PER_GRAPH):
            a, b = base + i, base + (i + 1) % NODES_PER_GRAPH
            src_list += [a, b]
            tgt_list += [b, a]
    edge_index = jnp.array([src_list, tgt_list], dtype=jnp.int32)

    out = discriminator_forward(x, edge_index, batch, seq, params, NUM_GRAPHS)
    out = jax.block_until_ready(out)

    ref = _reference(x, edge_index, batch, seq, params, NUM_GRAPHS)
    assert out.shape == (NUM_GRAPHS, 1)
    # bf16 MXU operands / approx reciprocal vs pure-f32 reference -> loose tol.
    assert jnp.allclose(out, ref, atol=2e-2, rtol=2e-2), (out, ref)
    print("KERNEL_OK")
</pallas_src>

<mosaic_0001>
module attributes {stable_mosaic.version = 11 : i64} {
  func.func @_discriminator_kernel(%arg0: memref<12x8xbf16, #tpu.memory_space<vmem>>, %arg1: memref<12x12xi8, #tpu.memory_space<vmem>>, %arg2: memref<2x12xbf16, #tpu.memory_space<vmem>>, %arg3: memref<2x16xbf16, #tpu.memory_space<vmem>>, %arg4: memref<8x128xbf16, #tpu.memory_space<vmem>>, %arg5: memref<32x128xbf16, #tpu.memory_space<vmem>>, %arg6: memref<80x32xbf16, #tpu.memory_space<vmem>>, %arg7: memref<32x128xbf16, #tpu.memory_space<vmem>>, %arg8: memref<4x128xf32, #tpu.memory_space<vmem>>, %arg9: memref<2x128xf32, #tpu.memory_space<vmem>>) attributes {dimension_semantics = [], scalar_prefetch = 0 : i64, scratch_operands = 0 : i64, tpu.core_type = #tpu.core_type<tc>} {
    %c0 = arith.constant 0 : index
    %c0_0 = arith.constant 0 : index
    %0 = vector.load %arg8[%c0, %c0_0] : memref<4x128xf32, #tpu.memory_space<vmem>>, vector<4x128xf32>
    %1 = vector.extract_strided_slice %0 {offsets = [0, 0], sizes = [1, 128], strides = [1, 1]} : vector<4x128xf32> to vector<1x128xf32>
    %2 = vector.extract_strided_slice %0 {offsets = [1, 0], sizes = [1, 128], strides = [1, 1]} : vector<4x128xf32> to vector<1x128xf32>
    %3 = vector.extract_strided_slice %0 {offsets = [2, 0], sizes = [1, 32], strides = [1, 1]} : vector<4x128xf32> to vector<1x32xf32>
    %4 = vector.extract_strided_slice %0 {offsets = [2, 32], sizes = [1, 32], strides = [1, 1]} : vector<4x128xf32> to vector<1x32xf32>
    %5 = vector.extract_strided_slice %0 {offsets = [3, 0], sizes = [1, 128], strides = [1, 1]} : vector<4x128xf32> to vector<1x128xf32>
    %c0_1 = arith.constant 0 : index
    %c0_2 = arith.constant 0 : index
    %6 = vector.load %arg0[%c0_1, %c0_2] : memref<12x8xbf16, #tpu.memory_space<vmem>>, vector<12x8xbf16>
    %c0_3 = arith.constant 0 : index
    %c0_4 = arith.constant 0 : index
    %7 = vector.load %arg4[%c0_3, %c0_4] : memref<8x128xbf16, #tpu.memory_space<vmem>>, vector<8x128xbf16>
    %cst = arith.constant dense<0.000000e+00> : vector<12x128xf32>
    %8 = tpu.matmul %6, %7, %cst {dimension_numbers = #tpu.dot_dimension_numbers<[1], [0], [0], [1], [0, 0, 1, 1], [], []>} : vector<12x8xbf16>, vector<8x128xbf16>, vector<12x128xf32> -> vector<12x128xf32>
    %9 = vector.broadcast %1 : vector<1x128xf32> to vector<12x128xf32>
    %10 = arith.addf %8, %9 : vector<12x128xf32>
    %11 = vector.extract_strided_slice %10 {offsets = [0, 0], sizes = [12, 96], strides = [1, 1]} : vector<12x128xf32> to vector<12x96xf32>
    %12 = arith.truncf %11 : vector<12x96xf32> to vector<12x96xbf16>
    %13 = vector.extract_strided_slice %12 {offsets = [0, 0], sizes = [12, 32], strides = [1, 1]} : vector<12x96xbf16> to vector<12x32xbf16>
    %14 = vector.extract_strided_slice %12 {offsets = [0, 32], sizes = [12, 32], strides = [1, 1]} : vector<12x96xbf16> to vector<12x32xbf16>
    %15 = vector.extract_strided_slice %12 {offsets = [0, 64], sizes = [12, 32], strides = [1, 1]} : vector<12x96xbf16> to vector<12x32xbf16>
    %16 = vector.extract_strided_slice %10 {offsets = [0, 96], sizes = [12, 32], strides = [1, 1]} : vector<12x128xf32> to vector<12x32xf32>
    %c0_5 = arith.constant 0 : index
    %c0_6 = arith.constant 0 : index
    %17 = vector.load %arg1[%c0_5, %c0_6] : memref<12x12xi8, #tpu.memory_space<vmem>>, vector<12x12xi8>
    %c0_i8 = arith.constant 0 : i8
    %18 = vector.broadcast %c0_i8 : i8 to vector<12x12xi8>
    %19 = arith.cmpi ne, %17, %18 : vector<12x12xi8>
    %cst_7 = arith.constant dense<0.000000e+00> : vector<12x12xf32>
    %20 = tpu.matmul %13, %14, %cst_7 {dimension_numbers = #tpu.dot_dimension_numbers<[1], [1], [0], [0], [0, 0, 1, 0], [], []>} : vector<12x32xbf16>, vector<12x32xbf16>, vector<12x12xf32> -> vector<12x12xf32>
    %cst_8 = arith.constant -1.000000e+30 : f32
    %21 = vector.broadcast %cst_8 : f32 to vector<12x12xf32>
    %22 = arith.select %19, %20, %21 : vector<12x12xi1>, vector<12x12xf32>
    %cst_9 = arith.constant dense<0xFF800000> : vector<12xf32>
    %23 = vector.multi_reduction <maximumf>, %22, %cst_9 [1] : vector<12x12xf32> to vector<12xf32>
    %24 = vector.shape_cast %23 : vector<12xf32> to vector<12x1xf32>
    %25 = vector.broadcast %24 : vector<12x1xf32> to vector<12x12xf32>
    %26 = arith.subf %22, %25 : vector<12x12xf32>
    %27 = math.exp %26 : vector<12x12xf32>
    %cst_10 = arith.constant 0.000000e+00 : f32
    %28 = vector.broadcast %cst_10 : f32 to vector<12x12xf32>
    %29 = arith.select %19, %27, %28 : vector<12x12xi1>, vector<12x12xf32>
    %cst_11 = arith.constant dense<0.000000e+00> : vector<12xf32>
    %30 = vector.multi_reduction <add>, %29, %cst_11 [1] : vector<12x12xf32> to vector<12xf32>
    %31 = vector.shape_cast %30 : vector<12xf32> to vector<12x1xf32>
    %cst_12 = arith.constant 1.000000e-16 : f32
    %32 = vector.broadcast %cst_12 : f32 to vector<12x1xf32>
    %33 = arith.maximumf %31, %32 : vector<12x1xf32>
    %34 = tpu.reciprocal %33 {approx = true} : vector<12x1xf32> -> vector<12x1xf32>
    %35 = arith.truncf %29 : vector<12x12xf32> to vector<12x12xbf16>
    %cst_13 = arith.constant dense<0.000000e+00> : vector<12x32xf32>
    %36 = tpu.matmul %35, %15, %cst_13 {dimension_numbers = #tpu.dot_dimension_numbers<[1], [0], [0], [1], [0, 0, 1, 1], [], []>} : vector<12x12xbf16>, vector<12x32xbf16>, vector<12x32xf32> -> vector<12x32xf32>
    %37 = vector.broadcast %34 : vector<12x1xf32> to vector<12x32xf32>
    %38 = arith.mulf %36, %37 : vector<12x32xf32>
    %39 = arith.addf %38, %16 : vector<12x32xf32>
    %cst_14 = arith.constant 0.000000e+00 : f32
    %40 = vector.broadcast %cst_14 : f32 to vector<12x32xf32>
    %41 = arith.maximumf %39, %40 : vector<12x32xf32>
    %42 = arith.truncf %41 : vector<12x32xf32> to vector<12x32xbf16>
    %c0_15 = arith.constant 0 : index
    %c0_16 = arith.constant 0 : index
    %43 = vector.load %arg5[%c0_15, %c0_16] : memref<32x128xbf16, #tpu.memory_space<vmem>>, vector<32x128xbf16>
    %cst_17 = arith.constant dense<0.000000e+00> : vector<12x128xf32>
    %44 = tpu.matmul %42, %43, %cst_17 {dimension_numbers = #tpu.dot_dimension_numbers<[1], [0], [0], [1], [0, 0, 1, 1], [], []>} : vector<12x32xbf16>, vector<32x128xbf16>, vector<12x128xf32> -> vector<12x128xf32>
    %45 = vector.broadcast %2 : vector<1x128xf32> to vector<12x128xf32>
    %46 = arith.addf %44, %45 : vector<12x128xf32>
    %47 = vector.extract_strided_slice %46 {offsets = [0, 0], sizes = [12, 96], strides = [1, 1]} : vector<12x128xf32> to vector<12x96xf32>
    %48 = arith.truncf %47 : vector<12x96xf32> to vector<12x96xbf16>
    %49 = vector.extract_strided_slice %48 {offsets = [0, 0], sizes = [12, 32], strides = [1, 1]} : vector<12x96xbf16> to vector<12x32xbf16>
    %50 = vector.extract_strided_slice %48 {offsets = [0, 32], sizes = [12, 32], strides = [1, 1]} : vector<12x96xbf16> to vector<12x32xbf16>
    %51 = vector.extract_strided_slice %48 {offsets = [0, 64], sizes = [12, 32], strides = [1, 1]} : vector<12x96xbf16> to vector<12x32xbf16>
    %52 = vector.extract_strided_slice %46 {offsets = [0, 96], sizes = [12, 32], strides = [1, 1]} : vector<12x128xf32> to vector<12x32xf32>
    %c0_18 = arith.constant 0 : index
    %c0_19 = arith.constant 0 : index
    %53 = vector.load %arg1[%c0_18, %c0_19] : memref<12x12xi8, #tpu.memory_space<vmem>>, vector<12x12xi8>
    %c0_i8_20 = arith.constant 0 : i8
    %54 = vector.broadcast %c0_i8_20 : i8 to vector<12x12xi8>
    %55 = arith.cmpi ne, %53, %54 : vector<12x12xi8>
    %cst_21 = arith.constant dense<0.000000e+00> : vector<12x12xf32>
    %56 = tpu.matmul %49, %50, %cst_21 {dimension_numbers = #tpu.dot_dimension_numbers<[1], [1], [0], [0], [0, 0, 1, 0], [], []>} : vector<12x32xbf16>, vector<12x32xbf16>, vector<12x12xf32> -> vector<12x12xf32>
    %cst_22 = arith.constant -1.000000e+30 : f32
    %57 = vector.broadcast %cst_22 : f32 to vector<12x12xf32>
    %58 = arith.select %55, %56, %57 : vector<12x12xi1>, vector<12x12xf32>
    %cst_23 = arith.constant dense<0xFF800000> : vector<12xf32>
    %59 = vector.multi_reduction <maximumf>, %58, %cst_23 [1] : vector<12x12xf32> to vector<12xf32>
    %60 = vector.shape_cast %59 : vector<12xf32> to vector<12x1xf32>
    %61 = vector.broadcast %60 : vector<12x1xf32> to vector<12x12xf32>
    %62 = arith.subf %58, %61 : vector<12x12xf32>
    %63 = math.exp %62 : vector<12x12xf32>
    %cst_24 = arith.constant 0.000000e+00 : f32
    %64 = vector.broadcast %cst_24 : f32 to vector<12x12xf32>
    %65 = arith.select %55, %63, %64 : vector<12x12xi1>, vector<12x12xf32>
    %cst_25 = arith.constant dense<0.000000e+00> : vector<12xf32>
    %66 = vector.multi_reduction <add>, %65, %cst_25 [1] : vector<12x12xf32> to vector<12xf32>
    %67 = vector.shape_cast %66 : vector<12xf32> to vector<12x1xf32>
    %cst_26 = arith.constant 1.000000e-16 : f32
    %68 = vector.broadcast %cst_26 : f32 to vector<12x1xf32>
    %69 = arith.maximumf %67, %68 : vector<12x1xf32>
    %70 = tpu.reciprocal %69 {approx = true} : vector<12x1xf32> -> vector<12x1xf32>
    %71 = arith.truncf %65 : vector<12x12xf32> to vector<12x12xbf16>
    %cst_27 = arith.constant dense<0.000000e+00> : vector<12x32xf32>
    %72 = tpu.matmul %71, %51, %cst_27 {dimension_numbers = #tpu.dot_dimension_numbers<[1], [0], [0], [1], [0, 0, 1, 1], [], []>} : vector<12x12xbf16>, vector<12x32xbf16>, vector<12x32xf32> -> vector<12x32xf32>
    %73 = vector.broadcast %70 : vector<12x1xf32> to vector<12x32xf32>
    %74 = arith.mulf %72, %73 : vector<12x32xf32>
    %75 = arith.addf %74, %52 : vector<12x32xf32>
    %cst_28 = arith.constant 0.000000e+00 : f32
    %76 = vector.broadcast %cst_28 : f32 to vector<12x32xf32>
    %77 = arith.maximumf %75, %76 : vector<12x32xf32>
    %c0_29 = arith.constant 0 : index
    %c0_30 = arith.constant 0 : index
    %78 = vector.load %arg2[%c0_29, %c0_30] : memref<2x12xbf16, #tpu.memory_space<vmem>>, vector<2x12xbf16>
    %79 = arith.truncf %77 : vector<12x32xf32> to vector<12x32xbf16>
    %cst_31 = arith.constant dense<0.000000e+00> : vector<2x32xf32>
    %80 = tpu.matmul %78, %79, %cst_31 {dimension_numbers = #tpu.dot_dimension_numbers<[1], [0], [0], [1], [0, 0, 1, 1], [], []>} : vector<2x12xbf16>, vector<12x32xbf16>, vector<2x32xf32> -> vector<2x32xf32>
    %c0_32 = arith.constant 0 : index
    %c0_33 = arith.constant 0 : index
    %81 = vector.load %arg6[%c0_32, %c0_33] : memref<80x32xbf16, #tpu.memory_space<vmem>>, vector<80x32xbf16>
    %82 = vector.extract_strided_slice %81 {offsets = [0, 0], sizes = [16, 32], strides = [1, 1]} : vector<80x32xbf16> to vector<16x32xbf16>
    %83 = vector.extract_strided_slice %81 {offsets = [16, 0], sizes = [32, 32], strides = [1, 1]} : vector<80x32xbf16> to vector<32x32xbf16>
    %84 = vector.extract_strided_slice %81 {offsets = [48, 0], sizes = [32, 32], strides = [1, 1]} : vector<80x32xbf16> to vector<32x32xbf16>
    %c0_34 = arith.constant 0 : index
    %c0_35 = arith.constant 0 : index
    %85 = vector.load %arg3[%c0_34, %c0_35] : memref<2x16xbf16, #tpu.memory_space<vmem>>, vector<2x16xbf16>
    %cst_36 = arith.constant dense<0.000000e+00> : vector<2x32xf32>
    %86 = tpu.matmul %85, %82, %cst_36 {dimension_numbers = #tpu.dot_dimension_numbers<[1], [0], [0], [1], [0, 0, 1, 1], [], []>} : vector<2x16xbf16>, vector<16x32xbf16>, vector<2x32xf32> -> vector<2x32xf32>
    %87 = vector.broadcast %3 : vector<1x32xf32> to vector<2x32xf32>
    %88 = arith.addf %86, %87 : vector<2x32xf32>
    %cst_37 = arith.constant 0.000000e+00 : f32
    %89 = vector.broadcast %cst_37 : f32 to vector<2x32xf32>
    %90 = arith.maximumf %88, %89 : vector<2x32xf32>
    %91 = arith.truncf %80 : vector<2x32xf32> to vector<2x32xbf16>
    %cst_38 = arith.constant dense<0.000000e+00> : vector<2x32xf32>
    %92 = tpu.matmul %91, %83, %cst_38 {dimension_numbers = #tpu.dot_dimension_numbers<[1], [0], [0], [1], [0, 0, 1, 1], [], []>} : vector<2x32xbf16>, vector<32x32xbf16>, vector<2x32xf32> -> vector<2x32xf32>
    %93 = arith.truncf %90 : vector<2x32xf32> to vector<2x32xbf16>
    %cst_39 = arith.constant dense<0.000000e+00> : vector<2x32xf32>
    %94 = tpu.matmul %93, %84, %cst_39 {dimension_numbers = #tpu.dot_dimension_numbers<[1], [0], [0], [1], [0, 0, 1, 1], [], []>} : vector<2x32xbf16>, vector<32x32xbf16>, vector<2x32xf32> -> vector<2x32xf32>
    %95 = arith.addf %92, %94 : vector<2x32xf32>
    %96 = vector.broadcast %4 : vector<1x32xf32> to vector<2x32xf32>
    %97 = arith.addf %95, %96 : vector<2x32xf32>
    %cst_40 = arith.constant 0.000000e+00 : f32
    %98 = vector.broadcast %cst_40 : f32 to vector<2x32xf32>
    %99 = arith.maximumf %97, %98 : vector<2x32xf32>
    %100 = arith.truncf %99 : vector<2x32xf32> to vector<2x32xbf16>
    %c0_41 = arith.constant 0 : index
    %c0_42 = arith.constant 0 : index
    %101 = vector.load %arg7[%c0_41, %c0_42] : memref<32x128xbf16, #tpu.memory_space<vmem>>, vector<32x128xbf16>
    %cst_43 = arith.constant dense<0.000000e+00> : vector<2x128xf32>
    %102 = tpu.matmul %100, %101, %cst_43 {dimension_numbers = #tpu.dot_dimension_numbers<[1], [0], [0], [1], [0, 0, 1, 1], [], []>} : vector<2x32xbf16>, vector<32x128xbf16>, vector<2x128xf32> -> vector<2x128xf32>
    %103 = vector.broadcast %5 : vector<1x128xf32> to vector<2x128xf32>
    %104 = arith.addf %102, %103 : vector<2x128xf32>
    %105 = arith.negf %104 : vector<2x128xf32>
    %106 = math.exp %105 : vector<2x128xf32>
    %cst_44 = arith.constant 1.000000e+00 : f32
    %107 = vector.broadcast %cst_44 : f32 to vector<2x128xf32>
    %108 = arith.addf %107, %106 : vector<2x128xf32>
    %109 = arith.divf %107, %108 : vector<2x128xf32>
    %c0_45 = arith.constant 0 : index
    %c0_46 = arith.constant 0 : index
    %110 = vector.load %arg9[%c0_45, %c0_46] : memref<2x128xf32, #tpu.memory_space<vmem>>, vector<2x128xf32>
    tpu.vector_store %arg9[%c0_45, %c0_46], %109 {strides = array<i32>} : memref<2x128xf32, #tpu.memory_space<vmem>>, vector<2x128xf32>,
    return
  }
}

</mosaic_0001>

<bundles_post_ra>
// kernel: tpu_custom_call.1
= control target key start
LH: loop header
LB: loop body
LE: loop exit
PB: predicated region body
PF: predicated region fallthrough
CT: control target
= control target key end

     0   :  { %vm53_vm0 = vcmask 1043456   ;;  %v959_v1 = vmov 0.0   ;;  %vm960_vm1 = vmmov 0   ;;  %vm49_vm2 = vcmask 64512   ;;  %s1184_s0 = inlined_call_operand.vmem [shape: bf16[12,8], index: 0, kind: input, shape index: {}]   ;;  %s1185_s1 = inlined_call_operand.vmem [shape: s8[12,12], index: 1, kind: input, shape index: {}]   ;;  %s1186_s2 = inlined_call_operand.vmem [shape: bf16[2,12], index: 2, kind: input, shape index: {}]   ;;  %s1187_s3 = inlined_call_operand.vmem [shape: bf16[2,16], index: 3, kind: input, shape index: {}]   ;;  %s1188_s4 = inlined_call_operand.vmem [shape: bf16[8,128], index: 4, kind: input, shape index: {}]   ;;  %s1189_s5 = inlined_call_operand.vmem [shape: bf16[32,128], index: 5, kind: input, shape index: {}]   ;;  %s1190_s6 = inlined_call_operand.vmem [shape: bf16[80,32], index: 6, kind: input, shape index: {}]   ;;  %s1191_s7 = inlined_call_operand.vmem [shape: bf16[32,128], index: 7, kind: input, shape index: {}]   ;;  %s1192_s8 = inlined_call_operand.vmem [shape: f32[4,128], index: 8, kind: input, shape index: {}]   ;;  %s1193_s9 = inlined_call_operand.hbm [shape: f32[2,128], index: 9, kind: output, shape index: {}]  }
   0x1   :  { %v39_v0 = vld [vmem:[%s1188_s4] sm:$0xf]  ;;  %824 = vmatprep.subr.bf16.mxu0 %v959_v1  ;;  %826 = vmatprep.mubr.msk.bf16.mxu0 %vm960_vm1, %v959_v1 }
   0x2   :  { %v55_v2 = vsel %vm53_vm0, %v39_v0, 0  ;;  %v905_v3 = vld [vmem:[%s1184_s0] sm:$0x3f]   ;;  %830 = vmatprep.subr.bf16.mxu1 %v959_v1  ;;  %832 = vmatprep.mubr.msk.bf16.mxu1 %vm960_vm1, %v959_v1 }
   0x3   :  { %825 = vmatpush3.bf16.msra.mxu0 %v55_v2 }
   0x4   :  { %836 = vmatprep.subr.bf16.mxu0 %v959_v1 }
   0x6   :  { %827 = vmatmul.mubr.msk.bf16.vlgmr.msra.gmra.mrb[0].mxu0 %vm49_vm2, %v905_v3 }
   0x7   :  { %838 = vmatprep.mubr.msk.bf16.mxu0 %vm960_vm1, %v959_v1 }
   0x8   :  { %14 = vsyncpa [#allocation3], 0  ;;  %v40_v4 = vlaneseq  ;;  %v1037_v7 = vld [vmem:[%s1192_s8] sm:$0xf]  ;;  %s961_s13 = smov 96   ;;  %vm106_vm3 = vcmask 261120  }
   0x9   :  { %v99_v18 = vld [vmem:[%s1185_s1] sm:$0x3]  ;;  %v100_v19 = vld [vmem:[%s1185_s1 + $0x2] sm:$0x1]  ;;  %v962_v20 = vmov 0   ;;  %vm162_vm7 = vcmask 97280  }
   0xa   :  { %v1031_v5 = vshrl.u32 %v40_v4, 7  ;;  %vm101_vm4 = vnez %v99_v18  ;;  %vm102_vm5 = vnez %v100_v19  ;;  %vm166_vm9 = vcmask 93184   ;;  %s963_s1 = smov 64   ;;  %s964_s17 = smov 32   ;;  %v906_v50 = vld [vmem:[%s1189_s5] sm:$0xff]   ;;  %v907_v51 = vld [vmem:[%s1189_s5 + $0x8] sm:$0xff]  }
   0xb   :  { %v154_v21 = vsel %vm101_vm4, 16843009, %v962_v20  ;;  %v155_v22 = vsel %vm102_vm5, 16843009, %v962_v20  ;;  %vm194_vm10 = vcmask 1045504   ;;  %v908_v25 = vld [vmem:[%s1190_s6] sm:$0xff]  }
   0xc   :  { %v42_v6 = vsub.s32 0, %v1031_v5  ;;  %v156_v23 = vunpack.c.0.s8 %v154_v21  ;;  %v157_v24 = vunpack.c.0.s8 %v155_v22  ;;  %v517_v27 = vld [vmem:[%s1187_s3] sm:$0x1]  ;;  %vm528_vm11 = vcmask 130048  }
   0xe   :  { %v43_v8 = vrot.slane %v1037_v7, %v42_v6  ;;  %vm1055_vm6 = vcmp.ne.s32.totalorder %v156_v23, 0  ;;  %vm1059_vm8 = vcmp.ne.s32.totalorder %v157_v24, 0 }
  0xd9   :  { %v91_v9 = vpop.f32.mrb[0].mxu0 }
  0xda   :  { %v828_v10 = vpop.f32.mrb[1].mxu0  ;;  %v1040_v12 = vadd.f32 %v91_v9, %v43_v8 }
  0xdb   :  { %v94_v11 = vpop.f32.mrb[2].mxu0  ;;  %v260_v10 = vsub.s32 1, %v1031_v5 }
  0xdc   :  { %v95_v13 = vadd.f32 %v94_v11, %v43_v8  ;;  %v829_v14 = vpop.f32.mrb[3].mxu0 }
  0xdd   :  { %v261_v11 = vrot.slane %v1037_v7, %v260_v10 }
  0xde   :  { %v98_v15 = vpack.c.bf16 %v95_v13, %v1040_v12 }
  0xe0   :  { %104 = vrot.lane.b32.xlu0 %v98_v15, %s961_s13 }
 0x152   :  { %v105_v16 = vpop.permute.xlu0 %104 }
 0x153   :  { %v111_v17 = vsel %vm106_vm3, %v105_v16, 0 }
 0x154   :  { %831 = vmatpush3.bf16.xpose.msra.mxu1 %v111_v17 }
 0x155   :  { %842 = vmatprep.subr.bf16.mxu1 %v959_v1 }
 0x15b   :  { %833 = vmatmul.mubr.msk.bf16.vlgmr.msra.gmra.mrb[0].mxu1 %vm106_vm3, %v98_v15 }
 0x15c   :  { %846 = vmatprep.mubr.msk.bf16.mxu1 %vm960_vm1, %v959_v1  ;;  %843 = vmatpush3.bf16.msra.mxu1 %v906_v50 }
 0x15d   :  { %844 = vmatprep.subr.bf16.mxu1 %v959_v1 }
 0x160   :  { %845 = vmatpush3.bf16.msra.mxu1 %v907_v51 }
 0x161   :  { %856 = vmatprep.subr.bf16.mxu1 %v959_v1 }
 0x22e   :  { %v147_v26 = vpop.f32.mrb[0].mxu1 }
 0x22f   :  { %v160_v28 = vsel %vm1055_vm6, %v147_v26, -1e+30  ;;  %v834_v29 = vpop.f32.mrb[1].mxu1 }
 0x230   :  { %v150_v30 = vpop.f32.mrb[2].mxu1  ;;  %v163_v31 = vsel %vm162_vm7, %v160_v28, -inf }
 0x231   :  { %v161_v32 = vsel %vm1059_vm8, %v150_v30, -1e+30  ;;  %164 = vmax.xlane.f32.xlu0 %v163_v31  ;;  %v835_v33 = vpop.f32.mrb[3].mxu1 }
 0x232   :  { %v167_v34 = vsel %vm166_vm9, %v161_v32, -inf }
 0x233   :  { %168 = vmax.xlane.f32.xlu1 %v167_v34 }
 0x244   :  { %189 = vrot.lane.b32.xlu1 %v98_v15, %s963_s1 }
 0x2be   :  { %v165_v35 = vpop.xlane.xlu0 %164 }
 0x2bf   :  { %v170_v36 = vsub.f32 %v160_v28, %v165_v35 }
 0x2c0   :  { %v169_v37 = vpop.xlane.xlu1 %168 }
 0x2c1   :  { %v172_v38 = vmul.f32 1.442695, %v170_v36  ;;  %v171_v39 = vsub.f32 %v161_v32, %v169_v37 }
 0x2c3   :  { %915 = vpow2.f32 %v172_v38  ;;  %v174_v40 = vmul.f32 1.442695, %v171_v39 }
 0x2c4   :  { %v190_v41 = vpop.permute.xlu1 %189 }
 0x2c5   :  { %917 = vpow2.f32 %v174_v40  ;;  %v196_v42 = vsel %vm194_vm10, %v190_v41, 0 }
 0x2c6   :  { %837 = vmatpush3.bf16.msra.mxu0 %v196_v42 }
 0x2c7   :  { %850 = vmatprep.subr.bf16.mxu0 %v959_v1 }
 0x2cd   :  { %v916_v43 = vpop.eup %915 }
 0x2ce   :  { %v176_v44 = vsel %vm1055_vm6, %v916_v43, 0.0 }
 0x2cf   :  { %v918_v45 = vpop.eup %917  ;;  %v178_v46 = vsel %vm162_vm7, %v176_v44, 0.0 }
 0x2d0   :  { %179 = vadd.xlane.f32.xlu1 %v178_v46  ;;  %v177_v47 = vsel %vm1059_vm8, %v918_v45, 0.0  ;;  %v520_v46 = vsub.s32 2, %v1031_v5 }
 0x2d1   :  { %v181_v48 = vsel %vm166_vm9, %v177_v47, 0.0  ;;  %v188_v49 = vpack.c.bf16 %v177_v47, %v176_v44 }
 0x2d2   :  { %182 = vadd.xlane.f32.xlu0 %v181_v48  ;;  %v521_v47 = vrot.slane %v1037_v7, %v520_v46  ;;  %v910_v48 = vld [vmem:[%s1190_s6 + $0x8] sm:$0xff]  }
 0x2d3   :  { %839 = vmatmul.mubr.msk.bf16.vlgmr.msra.gmra.mrb[4].mxu0 %vm162_vm7, %v188_v49 }
 0x2d4   :  { %852 = vmatprep.mubr.msk.bf16.mxu0 %vm960_vm1, %v959_v1 }
 0x2e1   :  { %245 = vrot.lane.b32.xlu1 %v95_v13, %s964_s17 }
 0x2e8   :  { %243 = vrot.lane.b32.xlu0 %v1040_v12, %s964_s17 }
 0x35d   :  { %v180_v52 = vpop.xlane.xlu1 %179 }
 0x35e   :  { %v184_v54 = vmax.f32 %v180_v52, 1e-16 }
 0x35f   :  { %v183_v53 = vpop.xlane.xlu0 %182 }
 0x360   :  { %v185_v55 = vmax.f32 %v183_v53, 1e-16  ;;  %919 = vrcp.f32 %v184_v54 }
 0x361   :  { %v246_v3 = vpop.permute.xlu1 %245 }
 0x362   :  { %921 = vrcp.f32 %v185_v55 }
 0x363   :  { %v244_v61 = vpop.permute.xlu0 %243 }
 0x36a   :  { %v920_v56 = vpop.eup %919 }
 0x36c   :  { %v922_v60 = vpop.eup %921 }
 0x3a6   :  { %v232_v57 = vpop.f32.mrb[4].mxu0 }
 0x3a7   :  { %v239_v58 = vmul.f32 %v920_v56, %v232_v57  ;;  %v840_v59 = vpop.f32.mrb[5].mxu0 }
 0x3a8   :  { %v235_v62 = vpop.f32.mrb[6].mxu0 }
 0x3a9   :  { %v249_v63 = vadd.f32 %v244_v61, %v239_v58  ;;  %v240_v0 = vmul.f32 %v922_v60, %v235_v62  ;;  %v841_v2 = vpop.f32.mrb[7].mxu0 }
 0x3ab   :  { %v250_v4 = vadd.f32 %v246_v3, %v240_v0  ;;  %v251_v6 = vmax.f32 %v249_v63, 0.0 }
 0x3ad   :  { %v252_v8 = vmax.f32 %v250_v4, 0.0 }
 0x3af   :  { %v253_v9 = vpack.c.bf16 %v252_v8, %v251_v6  ;;  %v459_v8 = vld [vmem:[%s1186_s2] sm:$0x1] }
 0x3b1   :  { %847 = vmatmul.mubr.msk.bf16.vlgmr.msra.gmra.mrb[4].mxu1 %vm106_vm3, %v253_v9  ;;  %v909_v9 = vld [vmem:[%s1190_s6 + $0x18] sm:$0xff]  }
 0x3b2   :  { %858 = vmatprep.mubr.msk.bf16.mxu1 %vm960_vm1, %v959_v1 }
 0x484   :  { %v311_v12 = vpop.f32.mrb[4].mxu1 }
 0x485   :  { %v848_v13 = vpop.f32.mrb[5].mxu1  ;;  %v312_v15 = vadd.f32 %v311_v12, %v261_v11 }
 0x486   :  { %v314_v14 = vpop.f32.mrb[6].mxu1 }
 0x487   :  { %v315_v16 = vadd.f32 %v314_v14, %v261_v11  ;;  %v849_v17 = vpop.f32.mrb[7].mxu1  ;;  %v911_v14 = vld [vmem:[%s1190_s6 + $0x20] sm:$0xff]  }
 0x489   :  { %v318_v18 = vpack.c.bf16 %v315_v16, %v312_v15 }
 0x48b   :  { %320 = vrot.lane.b32.xlu0 %v318_v18, %s961_s13 }
 0x4fd   :  { %v321_v19 = vpop.permute.xlu0 %320 }
 0x4fe   :  { %v326_v20 = vsel %vm106_vm3, %v321_v19, 0 }
 0x4ff   :  { %851 = vmatpush3.bf16.xpose.msra.mxu0 %v326_v20 }
 0x500   :  { %862 = vmatprep.subr.bf16.mxu0 %v959_v1 }
 0x506   :  { %853 = vmatmul.mubr.msk.bf16.vlgmr.msra.gmra.mrb[8].mxu0 %vm106_vm3, %v318_v18 }
 0x507   :  { %864 = vmatprep.mubr.msk.bf16.mxu0 %vm960_vm1, %v959_v1 }
 0x5d9   :  { %v362_v21 = vpop.f32.mrb[8].mxu0 }
 0x5da   :  { %v369_v22 = vsel %vm1055_vm6, %v362_v21, -1e+30  ;;  %v854_v23 = vpop.f32.mrb[9].mxu0 }
 0x5db   :  { %v365_v24 = vpop.f32.mrb[10].mxu0  ;;  %v371_v26 = vsel %vm162_vm7, %v369_v22, -inf }
 0x5dc   :  { %v370_v28 = vsel %vm1059_vm8, %v365_v24, -1e+30  ;;  %372 = vmax.xlane.f32.xlu0 %v371_v26  ;;  %v855_v29 = vpop.f32.mrb[11].mxu0 }
 0x5dd   :  { %v374_v30 = vsel %vm166_vm9, %v370_v28, -inf  ;;  %v913_v29 = vld [vmem:[%s1191_s7] sm:$0xff]  }
 0x5de   :  { %375 = vmax.xlane.f32.xlu1 %v374_v30 }
 0x5f2   :  { %396 = vrot.lane.b32.xlu0 %v318_v18, %s963_s1  ;;  %v912_v18 = vld [vmem:[%s1190_s6 + $0x10] sm:$0xff]  }
 0x5f6   :  { %449 = vrot.lane.b32.xlu0 %v312_v15, %s964_s17 }
 0x5fa   :  { %686 = vrot.lane.b32.xlu0 %v521_v47, %s961_s13 }
 0x669   :  { %v373_v31 = vpop.xlane.xlu0 %372 }
 0x66a   :  { %v377_v32 = vsub.f32 %v369_v22, %v373_v31  ;;  %v914_v31 = vld [vmem:[%s1191_s7 + $0x8] sm:$0xff]   ;;  %s965_s7 = smov [#allocation2]  }
 0x66b   :  { %v376_v33 = vpop.xlane.xlu1 %375  ;;  %s768_s13 = sshll.u32 %s965_s7, 4  ;;  %s769_s13 = int_to_ptr.vmem [resolvable:$true] %s768_s13 }
 0x66c   :  { %v379_v34 = vmul.f32 1.442695, %v377_v32  ;;  %v378_v35 = vsub.f32 %v370_v28, %v376_v33  ;;  %s935_s8 = scalar_lea.vmem %s769_s13, 32  ;;  %p940_p1 = scmp.lt.s32.totalorder %s769_s13, %s769_s13 }
 0x66d   :  { %v397_v36 = vpop.permute.xlu0 %396  ;;  %p936_p0 = scmp.ne.s32.totalorder %s769_s13, %s935_s8  ;;  %p941_p2 = scmp.lt.s32.totalorder %s935_s8, %s935_s8 }
 0x66e   :  { %923 = vpow2.f32 %v379_v34  ;;  %v381_v37 = vmul.f32 1.442695, %v378_v35  ;;  %v402_v38 = vsel %vm194_vm10, %v397_v36, 0 }
 0x66f   :  { %857 = vmatpush3.bf16.msra.mxu1 %v402_v38  ;;  %p942_p3 = por %p941_p2, %p940_p1 }
 0x670   :  { %925 = vpow2.f32 %v381_v37  ;;  %868 = vmatprep.subr.bf16.mxu1 %v959_v1 }
 0x671   :  { %v450_v58 = vpop.permute.xlu0 %449  ;;  %p943_p4 = pnand %p942_p3, %p936_p0 }
 0x675   :  { %v687_v33 = vpop.permute.xlu0 %686 }
 0x678   :  { %v924_v39 = vpop.eup %923 }
 0x679   :  { %v383_v40 = vsel %vm1055_vm6, %v924_v39, 0.0 }
 0x67a   :  { %v926_v41 = vpop.eup %925  ;;  %v385_v42 = vsel %vm162_vm7, %v383_v40, 0.0 }
 0x67b   :  { %386 = vadd.xlane.f32.xlu1 %v385_v42  ;;  %v384_v43 = vsel %vm1059_vm8, %v926_v41, 0.0  ;;  %v698_v41 = vsub.s32 3, %v1031_v5 }
 0x67c   :  { %v395_v44 = vpack.c.bf16 %v384_v43, %v383_v40  ;;  %v388_v45 = vsel %vm166_vm9, %v384_v43, 0.0 }
 0x67e   :  { %859 = vmatmul.mubr.msk.bf16.vlgmr.msra.gmra.mrb[8].mxu1 %vm162_vm7, %v395_v44 }
 0x67f   :  { %389 = vadd.xlane.f32.xlu1 %v388_v45  ;;  %870 = vmatprep.mubr.msk.bf16.mxu1 %vm960_vm1, %v959_v1 }
 0x680   :  { %869 = vmatpush3.bf16.msra.mxu1 %v908_v25 }
 0x681   :  { %882 = vmatprep.subr.bf16.mxu1 %v959_v1 }
 0x686   :  { %871 = vmatmul.mubr.msk.bf16.vlgmr.msra.gmra.mrb[12].mxu1 %vm528_vm11, %v517_v27 }
 0x687   :  { %886 = vmatprep.mubr.msk.bf16.mxu1 %vm960_vm1, %v959_v1  ;;  %883 = vmatpush3.bf16.msra.mxu1 %v910_v48 }
 0x688   :  { %884 = vmatprep.subr.bf16.mxu1 %v959_v1 }
 0x68b   :  { %885 = vmatpush3.bf16.msra.mxu1 %v912_v18 }
 0x690   :  { %451 = vrot.lane.b32.xlu1 %v315_v16, %s964_s17 }
 0x708   :  { %v387_v49 = vpop.xlane.xlu1 %386 }
 0x709   :  { %v391_v51 = vmax.f32 %v387_v49, 1e-16 }
 0x70b   :  { %927 = vrcp.f32 %v391_v51 }
 0x70c   :  { %v390_v50 = vpop.xlane.xlu1 %389 }
 0x70d   :  { %v392_v52 = vmax.f32 %v390_v50, 1e-16 }
 0x70f   :  { %929 = vrcp.f32 %v392_v52 }
 0x710   :  { %v452_v63 = vpop.permute.xlu1 %451 }
 0x715   :  { %v928_v53 = vpop.eup %927 }
 0x719   :  { %v930_v57 = vpop.eup %929 }
 0x751   :  { %v438_v54 = vpop.f32.mrb[8].mxu1 }
 0x752   :  { %v445_v55 = vmul.f32 %v928_v53, %v438_v54  ;;  %v860_v56 = vpop.f32.mrb[9].mxu1 }
 0x753   :  { %v441_v59 = vpop.f32.mrb[10].mxu1 }
 0x754   :  { %v455_v60 = vadd.f32 %v450_v58, %v445_v55  ;;  %v446_v61 = vmul.f32 %v930_v57, %v441_v59  ;;  %v861_v62 = vpop.f32.mrb[11].mxu1 }
 0x756   :  { %v456_v0 = vadd.f32 %v452_v63, %v446_v61  ;;  %v457_v2 = vmax.f32 %v455_v60, 0.0 }
 0x758   :  { %v458_v3 = vmax.f32 %v456_v0, 0.0 }
 0x759   :  { %v566_v10 = vpop.f32.mrb[12].mxu1 }
 0x75a   :  { %v460_v4 = vpack.c.bf16 %v458_v3, %v457_v2  ;;  %v567_v11 = vadd.f32 %v566_v10, %v521_v47  ;;  %v872_v12 = vpop.f32.mrb[13].mxu1 }
 0x75b   :  { %v569_v13 = vpop.f32.mrb[14].mxu1 }
 0x75c   :  { %v465_v6 = vsel %vm194_vm10, %v460_v4, 0  ;;  %v572_v15 = vmax.f32 %v567_v11, 0.0  ;;  %v873_v16 = vpop.f32.mrb[15].mxu1 }
 0x75d   :  { %863 = vmatpush3.bf16.msra.mxu0 %v465_v6 }
 0x75e   :  { %874 = vmatprep.subr.bf16.mxu0 %v959_v1  ;;  %v574_v17 = vpack.c.bf16 %v572_v15, %v572_v15 }
 0x760   :  { %865 = vmatmul.mubr.msk.bf16.vlgmr.msra.gmra.mrb[12].mxu0 %vm162_vm7, %v459_v8 }
 0x761   :  { %875 = vmatpush3.bf16.msra.mxu0 %v909_v9  ;;  %878 = vmatprep.mubr.msk.bf16.mxu0 %vm960_vm1, %v959_v1 }
 0x762   :  { %876 = vmatprep.subr.bf16.mxu0 %v959_v1 }
 0x765   :  { %877 = vmatpush3.bf16.msra.mxu0 %v911_v14 }
 0x766   :  { %890 = vmatprep.subr.bf16.mxu0 %v959_v1 }
 0x768   :  { %879 = vmatmul.mubr.msk.bf16.vlgmr.msra.gmra.mrb[16].mxu0 %vm106_vm3, %v574_v17 }
 0x769   :  { %894 = vmatprep.mubr.msk.bf16.mxu0 %vm960_vm1, %v959_v1  ;;  %891 = vmatpush3.bf16.msra.mxu0 %v913_v29 }
 0x76a   :  { %892 = vmatprep.subr.bf16.mxu0 %v959_v1  ;;  %v699_v1 = vrot.slane %v1037_v7, %v698_v41 }
 0x76d   :  { %893 = vmatpush3.bf16.msra.mxu0 %v914_v31 }
 0x833   :  { %v501_v19 = vpop.f32.mrb[12].mxu0 }
 0x834   :  { %v573_v20 = vpack.c.bf16 %v501_v19, %v501_v19  ;;  %v866_v21 = vpop.f32.mrb[13].mxu0 }
 0x835   :  { %v504_v22 = vpop.f32.mrb[14].mxu0 }
 0x836   :  { %v867_v23 = vpop.f32.mrb[15].mxu0  ;;  %887 = vmatmul.mubr.msk.bf16.vlgmr.msra.gmra.mrb[16].mxu1 %vm106_vm3, %v573_v20 }
 0x83b   :  { %v624_v24 = vpop.f32.mrb[16].mxu0 }
 0x83c   :  { %v880_v26 = vpop.f32.mrb[17].mxu0 }
 0x83d   :  { %v627_v28 = vpop.f32.mrb[18].mxu0 }
 0x83e   :  { %v881_v30 = vpop.f32.mrb[19].mxu0 }
 0x909   :  { %v679_v32 = vpop.f32.mrb[16].mxu1 }
 0x90a   :  { %v680_v34 = vadd.f32 %v679_v32, %v624_v24  ;;  %v888_v35 = vpop.f32.mrb[17].mxu1 }
 0x90b   :  { %v682_v36 = vpop.f32.mrb[18].mxu1 }
 0x90c   :  { %v689_v37 = vadd.f32 %v687_v33, %v680_v34  ;;  %v889_v38 = vpop.f32.mrb[19].mxu1 }
 0x90e   :  { %v690_v39 = vmax.f32 %v689_v37, 0.0 }
 0x910   :  { %v691_v40 = vpack.c.bf16 %v690_v39, %v690_v39 }
 0x912   :  { %895 = vmatmul.mubr.msk.bf16.vlgmr.msra.gmra.mrb[20].mxu0 %vm106_vm3, %v691_v40 }
 0x9e5   :  { %v749_v42 = vpop.f32.mrb[20].mxu0 }
 0x9e6   :  { %v750_v43 = vadd.f32 %v749_v42, %v699_v1  ;;  %v896_v44 = vpop.f32.mrb[21].mxu0 }
 0x9e7   :  { %v752_v45 = vpop.f32.mrb[22].mxu0 }
 0x9e8   :  { %v797_v25 = vmul.f32 -1.442695, %v750_v43  ;;  %v897_v27 = vpop.f32.mrb[23].mxu0 }
 0x9ea   :  { %931 = vpow2.f32 %v797_v25 }
 0x9f4   :  { %v932_v46 = vpop.eup %931 }
 0x9f5   :  { %v758_v47 = vadd.f32 1.0, %v932_v46 }
 0x9f7   :  { %933 = vrcp.f32 %v758_v47 }
 0xa01   :  { %v934_v48 = vpop.eup %933 }
 0xa02   :  { %761 = vst [vmem:[#allocation2] sm:$0x3] %v934_v48 }
 0xa03   :  { %946 = shalt.err (!%p943_p4)
}
 0xa04   :  { %s947_s16 = scalar_lea.hbm %s1193_s9, 32 }
 0xa05   :  { %p948_p5 = scmp.ne.s32.totalorder %s1193_s9, %s947_s16  ;;  %p951_p6 = scmp.lt.u32.totalorder %s947_s16, %s1193_s9 }
 0xa07   :  { %p953_p7 = pnand %p951_p6, %p948_p5 }
 0xa09   :  { %956 = shalt.err (!%p953_p7)
}
 0xa0a   :  { %771 = dma.vmem_to_hbm [thread:$0]  %s769_s13, 32, %s1193_s9, [#allocation3]  }
 0xa0b   :  { %957 = dma.done.wait [#allocation3], 32  }
 0xa0c   :  { %958 = vsyncadd [#allocation3], 4294967264 }
 0xa0d   :  { %775 = vsyncpa [#allocation3], 1 }

</bundles_post_ra>
